<compile_context>
chip_gen: v7x
topology: tpu7x:2x2x1
jax: 0.10.0
libtpu: 0.0.40
codegen_flags: <defaults>
</compile_context>

<pallas_src>
import functools
import math

import jax
import jax.numpy as jnp
from jax import lax
from jax.experimental import pallas as pl
from jax.experimental.pallas import tpu as pltpu


def _layernorm(v, gamma, beta, eps=1e-5):
    mu = jnp.mean(v, axis=-1, keepdims=True)
    vc = v - mu
    var = jnp.mean(vc * vc, axis=-1, keepdims=True)
    return vc * lax.rsqrt(var + eps) * gamma + beta


def diff_layer_kernel(
    x_ref, emb_ref,           # (tile_rows, H) f32 row slabs (tile_rows = seqs_per_tile * L)
    convw_ref,                # (3H, H)     bf16  packed conv taps [t=-1; t=0; t=+1]
    vecs_ref,                 # (8, H)      f32   [conv_b, g1, b1, ga, ba, bl, g2, b2]
    wqwl_ref,                 # (H, QKV+H)  bf16  [wq * 1/sqrt(L) | wl_top]
    wkv_ref,                  # (H, 2*QKV)  bf16  fused K|V projection
    wo_ref,                   # (QKV, H)    bf16
    wlb_ref,                  # (H, H)      bf16  wl_bot (multiplies extracted_emb)
    out_ref,                  # (tile_rows, H) f32
    ctx_ref,                  # VMEM scratch (tile_rows, QKV) f32
    *, L, QKV,
):
    rows, H = x_ref.shape
    n_seq = rows // L          # whole sequences per tile (tiles are sequence-aligned)
    bf = jnp.bfloat16
    f32 = jnp.float32

    x = x_ref[...]             # (rows, H) f32
    emb = emb_ref[...]         # (rows, H) f32

    # ---- Conv1d(H, H, 3, padding=1): +/-1 row shifts within the tile; iota mask
    # zeroes the per-sequence boundaries (also kills cross-sequence bleed and the
    # roll wrap-around).  Single fused K=3H matmul.
    l_ids = lax.broadcasted_iota(jnp.int32, (rows, 1), 0) % L
    x_prev = jnp.where(l_ids == 0, 0.0, jnp.roll(x, 1, axis=0))       # x[l-1]
    x_next = jnp.where(l_ids == L - 1, 0.0, jnp.roll(x, -1, axis=0))  # x[l+1]
    xc = jnp.concatenate([x_prev, x, x_next], axis=1).astype(bf)      # (rows, 3H)

    y = jnp.dot(xc, convw_ref[...], preferred_element_type=f32) + vecs_ref[0:1, :]

    # ---- norm1(relu(.)) ------------------------------------------------------
    xn = _layernorm(jnp.maximum(y, 0.0), vecs_ref[1:2, :], vecs_ref[2:3, :])
    xn_bf = xn.astype(bf)
    emb_bf = emb.astype(bf)

    # ---- fused Q | wl_top projection of xn, fused K | V projection of emb -----
    qw = jnp.dot(xn_bf, wqwl_ref[...], preferred_element_type=f32)    # (rows, QKV+H)
    q = qw[:, :QKV]
    z_top = qw[:, QKV:]                                               # xn @ wl_top
    kv = jnp.dot(emb_bf, wkv_ref[...], preferred_element_type=f32)    # (rows, 2*QKV)
    k = kv[:, :QKV]
    v = kv[:, QKV:]

    # ---- "flash" attention over the feature axis (SDPA on (B, QKV, L)) -------
    # Per-sequence contraction over L; small static loop, results written into
    # disjoint sublane ranges of the ctx scratch (no concatenate copy).
    for b in range(n_seq):
        lo = b * L
        qb = q[lo:lo + L].astype(bf)                                  # (L, QKV)
        kb = k[lo:lo + L].astype(bf)
        vb = v[lo:lo + L].astype(bf)
        s = lax.dot_general(qb, kb, (((0,), (0,)), ((), ())),
                            preferred_element_type=f32)               # (QKV, QKV)
        p = jnp.exp(s - jnp.max(s, axis=-1, keepdims=True))
        a = p * pl.reciprocal(jnp.sum(p, axis=-1, keepdims=True), approx=True)
        ctx_ref[lo:lo + L, :] = lax.dot_general(
            vb, a.astype(bf), (((1,), (1,)), ((), ())),
            preferred_element_type=f32)                               # (L, QKV)

    # ---- extracted_emb = ln_attn(emb + proj_out(ctx)) -------------------------
    proj = jnp.dot(ctx_ref[...].astype(bf), wo_ref[...], preferred_element_type=f32)
    extracted = _layernorm(emb + proj, vecs_ref[3:4, :], vecs_ref[4:5, :])

    # ---- linear(cat([xn, extracted])) = z_top + extracted @ wl_bot + bl -------
    z = (z_top
         + jnp.dot(extracted.astype(bf), wlb_ref[...], preferred_element_type=f32)
         + vecs_ref[5:6, :])
    z = _layernorm(jnp.maximum(z, 0.0), vecs_ref[6:7, :], vecs_ref[7:8, :])

    # Dropout(p=0.1) is stochastic; eval-mode identity here.
    # TODO(synk): training-mode dropout (stateful RNG) not implemented.
    out_ref[...] = z


def _pick_seqs_per_tile(B, L, H, QKV, budget_bytes=6 << 20):
    """Shape-only tile sizing (no device sniffing): keep per-tile intermediates
    within a conservative VMEM budget, and keep >=2 grid steps when B >= 2 so the
    DMA pipeline has work to overlap and megacore can shard the parallel axis."""
    per_row = 4 * (20 * H + 5 * QKV)          # generous f32-equivalent estimate
    fixed = 3 * 4 * QKV * QKV                 # (QKV, QKV) softmax-phase tiles
    spb = max(1, (budget_bytes - fixed) // max(1, per_row * L))
    spb = min(spb, max(1, B // 2))
    while B % spb != 0:
        spb -= 1
    return max(1, spb)


def prepare_params(p, L):
    """One-time parameter prep: pack vectors, fuse weights, fold scale, cast bf16."""
    bf = jnp.bfloat16
    H = p["wq"].shape[0]
    vecs = jnp.concatenate([p["conv_b"], p["g1"], p["b1"], p["ga"], p["ba"],
                            p["bl"], p["g2"], p["b2"]], axis=0).astype(jnp.float32)
    wq_scaled = p["wq"] * (1.0 / math.sqrt(L))                          # SDPA scale folded
    return {
        "convw": p["conv_w"].reshape(3 * H, H).astype(bf),              # (3H, H)
        "vecs": vecs,                                                   # (8, H)
        "wqwl": jnp.concatenate([wq_scaled, p["wl"][:H]], axis=1).astype(bf),  # (H, QKV+H)
        "wkv": jnp.concatenate([p["wk"], p["wv"]], axis=1).astype(bf),  # (H, 2*QKV)
        "wo": p["wo"].astype(bf),                                       # (QKV, H)
        "wl_bot": p["wl"][H:].astype(bf),                               # (H, H)
    }


def _full_spec(a):
    nd = a.ndim
    return pl.BlockSpec(a.shape, lambda i, _nd=nd: (0,) * _nd)


def diff_layer(x, embeddings, kp, *, seqs_per_tile=None):
    B, L, H = x.shape
    QKV = kp["wkv"].shape[1] // 2
    if seqs_per_tile is None:
        seqs_per_tile = _pick_seqs_per_tile(B, L, H, QKV)
    if B % seqs_per_tile != 0:
        seqs_per_tile = 1
    tile_rows = seqs_per_tile * L
    rows = B * L
    # (8, 128) rule: second-to-last block dim must be a multiple of 8 unless it
    # spans the full array; fall back to a single full tile otherwise.
    if tile_rows % 8 != 0 and tile_rows != rows:
        seqs_per_tile, tile_rows = B, rows
    num_tiles = rows // tile_rows

    x2 = x.reshape(rows, H)                 # contiguous reshape, no copy
    emb2 = embeddings.reshape(rows, H)

    row_spec = pl.BlockSpec((tile_rows, H), lambda i: (i, 0))
    param_order = ["convw", "vecs", "wqwl", "wkv", "wo", "wl_bot"]
    param_arrays = [kp[name] for name in param_order]

    kernel = functools.partial(diff_layer_kernel, L=L, QKV=QKV)
    out = pl.pallas_call(
        kernel,
        out_shape=jax.ShapeDtypeStruct((rows, H), jnp.float32),
        grid=(num_tiles,),
        in_specs=[row_spec, row_spec] + [_full_spec(a) for a in param_arrays],
        out_specs=row_spec,
        scratch_shapes=[pltpu.VMEM((tile_rows, QKV), jnp.float32)],
        compiler_params=pltpu.CompilerParams(
            dimension_semantics=("parallel",),
            vmem_limit_bytes=48 * 1024 * 1024),   # > v5e 16 MiB default, < v7x 64 MiB physical
    )(x2, emb2, *param_arrays)
    return out.reshape(B, L, H)


def make_params(key, H, rank):
    QKV = rank * H
    ks = jax.random.split(key, 12)
    n = lambda k, s, sc: (sc * jax.random.normal(k, s)).astype(jnp.float32)
    return {
        # conv weight stored as (3, H_in, H_out): conv_w[t] = torch_weight[:, :, t].T
        "conv_w": n(ks[0], (3, H, H), 1.0 / math.sqrt(3 * H)),
        "conv_b": n(ks[1], (1, H), 0.02),
        "g1": jnp.ones((1, H), jnp.float32) + n(ks[2], (1, H), 0.05),
        "b1": n(ks[3], (1, H), 0.05),
        # linear weights stored pre-transposed: x @ W (W = torch_weight.T)
        "wq": n(ks[4], (H, QKV), 1.0 / math.sqrt(H)),
        "wk": n(ks[5], (H, QKV), 1.0 / math.sqrt(H)),
        "wv": n(ks[6], (H, QKV), 1.0 / math.sqrt(H)),
        "wo": n(ks[7], (QKV, H), 1.0 / math.sqrt(QKV)),
        "ga": jnp.ones((1, H), jnp.float32) + n(ks[8], (1, H), 0.05),
        "ba": n(ks[9], (1, H), 0.05),
        "wl": n(ks[10], (2 * H, H), 1.0 / math.sqrt(2 * H)),
        "bl": n(ks[11], (1, H), 0.02),
        "g2": jnp.ones((1, H), jnp.float32),
        "b2": jnp.zeros((1, H), jnp.float32),
    }


def ref_forward(x, emb, p):
    """Pure-JAX f32 reference mirroring the PyTorch forward (attn_impl='flash')."""
    B, L, H = x.shape
    x_pad = jnp.pad(x, ((0, 0), (1, 1), (0, 0)))
    y = (x_pad[:, 0:L] @ p["conv_w"][0] + x_pad[:, 1:L + 1] @ p["conv_w"][1]
         + x_pad[:, 2:L + 2] @ p["conv_w"][2] + p["conv_b"])

    def ln(v, g, b):
        mu = v.mean(-1, keepdims=True)
        var = ((v - mu) ** 2).mean(-1, keepdims=True)
        return (v - mu) / jnp.sqrt(var + 1e-5) * g + b

    xn = ln(jax.nn.relu(y), p["g1"], p["b1"])
    Q, K, V = xn @ p["wq"], emb @ p["wk"], emb @ p["wv"]
    Qh, Kh, Vh = (jnp.swapaxes(t, 1, 2) for t in (Q, K, V))
    s = Qh @ jnp.swapaxes(Kh, 1, 2) / math.sqrt(L)
    ctx = jnp.swapaxes(jax.nn.softmax(s, axis=-1) @ Vh, 1, 2)
    extracted = ln(emb + ctx @ p["wo"], p["ga"], p["ba"])
    cat = jnp.concatenate([xn, extracted], axis=-1)
    return ln(jax.nn.relu(cat @ p["wl"] + p["bl"]), p["g2"], p["b2"])


if __name__ == "__main__":
    B, L, H, rank = 2, 16, 32, 4   # qkv_dim = rank * H = 128
    key = jax.random.PRNGKey(0)
    kx, ke, kparam = jax.random.split(key, 3)
    x = jax.random.normal(kx, (B, L, H), jnp.float32)
    embeddings = jax.random.normal(ke, (B, L, H), jnp.float32)
    params = make_params(kparam, H, rank)
    kparams = prepare_params(params, L)

    out = jax.block_until_ready(diff_layer(x, embeddings, kparams))
    ref = jax.block_until_ready(ref_forward(x, embeddings, params))
    assert out.shape == (B, L, H)
    # Kernel uses bf16 MXU operands with f32 accumulation (and an approx EUP
    # reciprocal in the softmax); tolerance covers rounding vs the f32 reference.
    err = float(jnp.max(jnp.abs(out - ref)))
    assert err < 5e-2, f"mismatch vs reference: {err}"
    print("KERNEL_OK")
</pallas_src>

<mosaic_0001>
module attributes {stable_mosaic.version = 11 : i64} {
  func.func @diff_layer_kernel(%arg0: i32, %arg1: memref<16x32xf32, #tpu.memory_space<vmem>>, %arg2: memref<16x32xf32, #tpu.memory_space<vmem>>, %arg3: memref<96x32xbf16, #tpu.memory_space<vmem>>, %arg4: memref<8x32xf32, #tpu.memory_space<vmem>>, %arg5: memref<32x160xbf16, #tpu.memory_space<vmem>>, %arg6: memref<32x256xbf16, #tpu.memory_space<vmem>>, %arg7: memref<128x32xbf16, #tpu.memory_space<vmem>>, %arg8: memref<32x32xbf16, #tpu.memory_space<vmem>>, %arg9: memref<16x32xf32, #tpu.memory_space<vmem>>, %arg10: memref<16x128xf32, #tpu.memory_space<vmem>>) attributes {dimension_semantics = [#tpu.dimension_semantics<parallel>], iteration_bounds = array<i64: 2>, scalar_prefetch = 0 : i64, scratch_operands = 1 : i64, tpu.core_type = #tpu.core_type<tc>, window_params = [{transform_indices = @transform_0, window_bounds = array<i64: 16, 32>}, {transform_indices = @transform_1, window_bounds = array<i64: 16, 32>}, {pipeline_mode = #tpu.pipeline_mode<synchronous>, transform_indices = @transform_2, window_bounds = array<i64: 96, 32>}, {pipeline_mode = #tpu.pipeline_mode<synchronous>, transform_indices = @transform_3, window_bounds = array<i64: 8, 32>}, {pipeline_mode = #tpu.pipeline_mode<synchronous>, transform_indices = @transform_4, window_bounds = array<i64: 32, 160>}, {pipeline_mode = #tpu.pipeline_mode<synchronous>, transform_indices = @transform_5, window_bounds = array<i64: 32, 256>}, {pipeline_mode = #tpu.pipeline_mode<synchronous>, transform_indices = @transform_6, window_bounds = array<i64: 128, 32>}, {pipeline_mode = #tpu.pipeline_mode<synchronous>, transform_indices = @transform_7, window_bounds = array<i64: 32, 32>}, {transform_indices = @transform_8, window_bounds = array<i64: 16, 32>}]} {
    %c0 = arith.constant 0 : index
    %c0_0 = arith.constant 0 : index
    %0 = vector.load %arg1[%c0, %c0_0] : memref<16x32xf32, #tpu.memory_space<vmem>>, vector<16x32xf32>
    %c0_1 = arith.constant 0 : index
    %c0_2 = arith.constant 0 : index
    %1 = vector.load %arg2[%c0_1, %c0_2] : memref<16x32xf32, #tpu.memory_space<vmem>>, vector<16x32xf32>
    %2 = tpu.iota {dimensions = array<i32: 0>} : vector<16x1xi32>
    %c16_i32 = arith.constant 16 : i32
    %c0_i32 = arith.constant 0 : i32
    %3 = arith.cmpi eq, %c16_i32, %c0_i32 : i32
    %c1_i32 = arith.constant 1 : i32
    %4 = arith.select %3, %c1_i32, %c16_i32 : i32
    %5 = vector.broadcast %4 : i32 to vector<16x1xi32>
    %6 = arith.remsi %2, %5 : vector<16x1xi32>
    %c0_i32_3 = arith.constant 0 : i32
    %7 = vector.broadcast %c0_i32_3 : i32 to vector<16x1xi32>
    %8 = arith.cmpi ne, %6, %7 : vector<16x1xi32>
    %c0_i32_4 = arith.constant 0 : i32
    %9 = vector.broadcast %c0_i32_4 : i32 to vector<16x1xi32>
    %10 = arith.cmpi slt, %6, %9 : vector<16x1xi32>
    %c0_i32_5 = arith.constant 0 : i32
    %11 = arith.cmpi slt, %4, %c0_i32_5 : i32
    %12 = vector.broadcast %11 : i1 to vector<16x1xi1>
    %13 = vector.broadcast %12 : vector<16x1xi1> to vector<16x1xi1>
    %14 = arith.xori %10, %13 : vector<16x1xi1>
    %15 = arith.andi %14, %8 : vector<16x1xi1>
    %16 = vector.broadcast %4 : i32 to vector<16x1xi32>
    %17 = arith.addi %6, %16 : vector<16x1xi32>
    %18 = arith.select %15, %17, %6 : vector<16x1xi1>, vector<16x1xi32>
    %c0_i32_6 = arith.constant 0 : i32
    %19 = vector.broadcast %c0_i32_6 : i32 to vector<16x1xi32>
    %20 = arith.cmpi eq, %18, %19 : vector<16x1xi32>
    %21 = vector.extract_strided_slice %0 {offsets = [15, 0], sizes = [1, 32], strides = [1, 1]} : vector<16x32xf32> to vector<1x32xf32>
    %22 = vector.extract_strided_slice %0 {offsets = [0, 0], sizes = [15, 32], strides = [1, 1]} : vector<16x32xf32> to vector<15x32xf32>
    %23 = tpu.concatenate %21, %22 in 0 : vector<1x32xf32>, vector<15x32xf32> -> vector<16x32xf32>
    %cst = arith.constant 0.000000e+00 : f32
    %24 = vector.shape_cast %20 : vector<16x1xi1> to vector<16x1xi1>
    %25 = vector.broadcast %24 : vector<16x1xi1> to vector<16x32xi1>
    %26 = vector.broadcast %cst : f32 to vector<16x32xf32>
    %27 = arith.select %25, %26, %23 : vector<16x32xi1>, vector<16x32xf32>
    %c15_i32 = arith.constant 15 : i32
    %28 = vector.broadcast %c15_i32 : i32 to vector<16x1xi32>
    %29 = arith.cmpi eq, %18, %28 : vector<16x1xi32>
    %30 = vector.extract_strided_slice %0 {offsets = [1, 0], sizes = [15, 32], strides = [1, 1]} : vector<16x32xf32> to vector<15x32xf32>
    %31 = vector.extract_strided_slice %0 {offsets = [0, 0], sizes = [1, 32], strides = [1, 1]} : vector<16x32xf32> to vector<1x32xf32>
    %32 = tpu.concatenate %30, %31 in 0 : vector<15x32xf32>, vector<1x32xf32> -> vector<16x32xf32>
    %cst_7 = arith.constant 0.000000e+00 : f32
    %33 = vector.shape_cast %29 : vector<16x1xi1> to vector<16x1xi1>
    %34 = vector.broadcast %33 : vector<16x1xi1> to vector<16x32xi1>
    %35 = vector.broadcast %cst_7 : f32 to vector<16x32xf32>
    %36 = arith.select %34, %35, %32 : vector<16x32xi1>, vector<16x32xf32>
    %37 = tpu.concatenate %27, %0, %36 in 1 : vector<16x32xf32>, vector<16x32xf32>, vector<16x32xf32> -> vector<16x96xf32>
    %38 = arith.truncf %37 : vector<16x96xf32> to vector<16x96xbf16>
    %c0_8 = arith.constant 0 : index
    %c0_9 = arith.constant 0 : index
    %39 = vector.load %arg3[%c0_8, %c0_9] : memref<96x32xbf16, #tpu.memory_space<vmem>>, vector<96x32xbf16>
    %cst_10 = arith.constant dense<0.000000e+00> : vector<16x32xf32>
    %40 = tpu.matmul %38, %39, %cst_10 {dimension_numbers = #tpu.dot_dimension_numbers<[1], [0], [0], [1], [0, 0, 1, 1], [], []>} : vector<16x96xbf16>, vector<96x32xbf16>, vector<16x32xf32> -> vector<16x32xf32>
    %c0_11 = arith.constant 0 : index
    %c0_12 = arith.constant 0 : index
    %41 = vector.load %arg4[%c0_11, %c0_12] : memref<8x32xf32, #tpu.memory_space<vmem>>, vector<1x32xf32>
    %42 = vector.broadcast %41 : vector<1x32xf32> to vector<16x32xf32>
    %43 = arith.addf %40, %42 : vector<16x32xf32>
    %cst_13 = arith.constant 0.000000e+00 : f32
    %44 = vector.broadcast %cst_13 : f32 to vector<16x32xf32>
    %45 = arith.maximumf %43, %44 : vector<16x32xf32>
    %c1 = arith.constant 1 : index
    %c0_14 = arith.constant 0 : index
    %46 = vector.load %arg4[%c1, %c0_14] : memref<8x32xf32, #tpu.memory_space<vmem>>, vector<1x32xf32>
    %c2 = arith.constant 2 : index
    %c0_15 = arith.constant 0 : index
    %47 = vector.load %arg4[%c2, %c0_15] : memref<8x32xf32, #tpu.memory_space<vmem>>, vector<1x32xf32>
    %cst_16 = arith.constant dense<0.000000e+00> : vector<16xf32>
    %48 = vector.multi_reduction <add>, %45, %cst_16 [1] : vector<16x32xf32> to vector<16xf32>
    %49 = vector.shape_cast %48 : vector<16xf32> to vector<16x1xf32>
    %cst_17 = arith.constant 3.200000e+01 : f32
    %50 = vector.broadcast %cst_17 : f32 to vector<16x1xf32>
    %51 = arith.divf %49, %50 : vector<16x1xf32>
    %52 = vector.broadcast %51 : vector<16x1xf32> to vector<16x32xf32>
    %53 = arith.subf %45, %52 : vector<16x32xf32>
    %54 = arith.mulf %53, %53 : vector<16x32xf32>
    %cst_18 = arith.constant dense<0.000000e+00> : vector<16xf32>
    %55 = vector.multi_reduction <add>, %54, %cst_18 [1] : vector<16x32xf32> to vector<16xf32>
    %56 = vector.shape_cast %55 : vector<16xf32> to vector<16x1xf32>
    %cst_19 = arith.constant 3.200000e+01 : f32
    %57 = vector.broadcast %cst_19 : f32 to vector<16x1xf32>
    %58 = arith.divf %56, %57 : vector<16x1xf32>
    %cst_20 = arith.constant 9.99999974E-6 : f32
    %59 = vector.broadcast %cst_20 : f32 to vector<16x1xf32>
    %60 = arith.addf %58, %59 : vector<16x1xf32>
    %61 = math.rsqrt %60 : vector<16x1xf32>
    %62 = vector.broadcast %61 : vector<16x1xf32> to vector<16x32xf32>
    %63 = arith.mulf %53, %62 : vector<16x32xf32>
    %64 = vector.broadcast %46 : vector<1x32xf32> to vector<16x32xf32>
    %65 = arith.mulf %63, %64 : vector<16x32xf32>
    %66 = vector.broadcast %47 : vector<1x32xf32> to vector<16x32xf32>
    %67 = arith.addf %65, %66 : vector<16x32xf32>
    %68 = arith.truncf %67 : vector<16x32xf32> to vector<16x32xbf16>
    %69 = arith.truncf %1 : vector<16x32xf32> to vector<16x32xbf16>
    %c0_21 = arith.constant 0 : index
    %c0_22 = arith.constant 0 : index
    %70 = vector.load %arg5[%c0_21, %c0_22] : memref<32x160xbf16, #tpu.memory_space<vmem>>, vector<32x160xbf16>
    %cst_23 = arith.constant dense<0.000000e+00> : vector<16x160xf32>
    %71 = tpu.matmul %68, %70, %cst_23 {dimension_numbers = #tpu.dot_dimension_numbers<[1], [0], [0], [1], [0, 0, 1, 1], [], []>} : vector<16x32xbf16>, vector<32x160xbf16>, vector<16x160xf32> -> vector<16x160xf32>
    %72 = vector.extract_strided_slice %71 {offsets = [0, 0], sizes = [16, 128], strides = [1, 1]} : vector<16x160xf32> to vector<16x128xf32>
    %73 = vector.extract_strided_slice %71 {offsets = [0, 128], sizes = [16, 32], strides = [1, 1]} : vector<16x160xf32> to vector<16x32xf32>
    %c0_24 = arith.constant 0 : index
    %c0_25 = arith.constant 0 : index
    %74 = vector.load %arg6[%c0_24, %c0_25] : memref<32x256xbf16, #tpu.memory_space<vmem>>, vector<32x256xbf16>
    %cst_26 = arith.constant dense<0.000000e+00> : vector<16x256xf32>
    %75 = tpu.matmul %69, %74, %cst_26 {dimension_numbers = #tpu.dot_dimension_numbers<[1], [0], [0], [1], [0, 0, 1, 1], [], []>} : vector<16x32xbf16>, vector<32x256xbf16>, vector<16x256xf32> -> vector<16x256xf32>
    %76 = vector.extract_strided_slice %75 {offsets = [0, 0], sizes = [16, 128], strides = [1, 1]} : vector<16x256xf32> to vector<16x128xf32>
    %77 = vector.extract_strided_slice %75 {offsets = [0, 128], sizes = [16, 128], strides = [1, 1]} : vector<16x256xf32> to vector<16x128xf32>
    %78 = arith.truncf %72 : vector<16x128xf32> to vector<16x128xbf16>
    %79 = arith.truncf %76 : vector<16x128xf32> to vector<16x128xbf16>
    %80 = arith.truncf %77 : vector<16x128xf32> to vector<16x128xbf16>
    %cst_27 = arith.constant dense<0.000000e+00> : vector<128x128xf32>
    %81 = tpu.matmul %78, %79, %cst_27 {dimension_numbers = #tpu.dot_dimension_numbers<[0], [0], [1], [1], [0, 1, 1, 1], [], []>} : vector<16x128xbf16>, vector<16x128xbf16>, vector<128x128xf32> -> vector<128x128xf32>
    %cst_28 = arith.constant dense<0xFF800000> : vector<128xf32>
    %82 = vector.multi_reduction <maximumf>, %81, %cst_28 [1] : vector<128x128xf32> to vector<128xf32>
    %83 = vector.shape_cast %82 : vector<128xf32> to vector<128x1xf32>
    %84 = vector.broadcast %83 : vector<128x1xf32> to vector<128x128xf32>
    %85 = arith.subf %81, %84 : vector<128x128xf32>
    %86 = math.exp %85 : vector<128x128xf32>
    %cst_29 = arith.constant dense<0.000000e+00> : vector<128xf32>
    %87 = vector.multi_reduction <add>, %86, %cst_29 [1] : vector<128x128xf32> to vector<128xf32>
    %88 = vector.shape_cast %87 : vector<128xf32> to vector<128x1xf32>
    %89 = tpu.reciprocal %88 {approx = true} : vector<128x1xf32> -> vector<128x1xf32>
    %90 = vector.broadcast %89 : vector<128x1xf32> to vector<128x128xf32>
    %91 = arith.mulf %86, %90 : vector<128x128xf32>
    %92 = arith.truncf %91 : vector<128x128xf32> to vector<128x128xbf16>
    %cst_30 = arith.constant dense<0.000000e+00> : vector<16x128xf32>
    %93 = tpu.matmul %80, %92, %cst_30 {dimension_numbers = #tpu.dot_dimension_numbers<[1], [1], [0], [0], [0, 0, 1, 0], [], []>} : vector<16x128xbf16>, vector<128x128xbf16>, vector<16x128xf32> -> vector<16x128xf32>
    %c0_31 = arith.constant 0 : index
    %c0_32 = arith.constant 0 : index
    %94 = vector.load %arg10[%c0_31, %c0_32] : memref<16x128xf32, #tpu.memory_space<vmem>>, vector<16x128xf32>
    tpu.vector_store %arg10[%c0_31, %c0_32], %93 {strides = array<i32>} : memref<16x128xf32, #tpu.memory_space<vmem>>, vector<16x128xf32>,
    %c0_33 = arith.constant 0 : index
    %c0_34 = arith.constant 0 : index
    %95 = vector.load %arg10[%c0_33, %c0_34] : memref<16x128xf32, #tpu.memory_space<vmem>>, vector<16x128xf32>
    %96 = arith.truncf %95 : vector<16x128xf32> to vector<16x128xbf16>
    %c0_35 = arith.constant 0 : index
    %c0_36 = arith.constant 0 : index
    %97 = vector.load %arg7[%c0_35, %c0_36] : memref<128x32xbf16, #tpu.memory_space<vmem>>, vector<128x32xbf16>
    %cst_37 = arith.constant dense<0.000000e+00> : vector<16x32xf32>
    %98 = tpu.matmul %96, %97, %cst_37 {dimension_numbers = #tpu.dot_dimension_numbers<[1], [0], [0], [1], [0, 0, 1, 1], [], []>} : vector<16x128xbf16>, vector<128x32xbf16>, vector<16x32xf32> -> vector<16x32xf32>
    %99 = arith.addf %1, %98 : vector<16x32xf32>
    %c3 = arith.constant 3 : index
    %c0_38 = arith.constant 0 : index
    %100 = vector.load %arg4[%c3, %c0_38] : memref<8x32xf32, #tpu.memory_space<vmem>>, vector<1x32xf32>
    %c4 = arith.constant 4 : index
    %c0_39 = arith.constant 0 : index
    %101 = vector.load %arg4[%c4, %c0_39] : memref<8x32xf32, #tpu.memory_space<vmem>>, vector<1x32xf32>
    %cst_40 = arith.constant dense<0.000000e+00> : vector<16xf32>
    %102 = vector.multi_reduction <add>, %99, %cst_40 [1] : vector<16x32xf32> to vector<16xf32>
    %103 = vector.shape_cast %102 : vector<16xf32> to vector<16x1xf32>
    %cst_41 = arith.constant 3.200000e+01 : f32
    %104 = vector.broadcast %cst_41 : f32 to vector<16x1xf32>
    %105 = arith.divf %103, %104 : vector<16x1xf32>
    %106 = vector.broadcast %105 : vector<16x1xf32> to vector<16x32xf32>
    %107 = arith.subf %99, %106 : vector<16x32xf32>
    %108 = arith.mulf %107, %107 : vector<16x32xf32>
    %cst_42 = arith.constant dense<0.000000e+00> : vector<16xf32>
    %109 = vector.multi_reduction <add>, %108, %cst_42 [1] : vector<16x32xf32> to vector<16xf32>
    %110 = vector.shape_cast %109 : vector<16xf32> to vector<16x1xf32>
    %cst_43 = arith.constant 3.200000e+01 : f32
    %111 = vector.broadcast %cst_43 : f32 to vector<16x1xf32>
    %112 = arith.divf %110, %111 : vector<16x1xf32>
    %cst_44 = arith.constant 9.99999974E-6 : f32
    %113 = vector.broadcast %cst_44 : f32 to vector<16x1xf32>
    %114 = arith.addf %112, %113 : vector<16x1xf32>
    %115 = math.rsqrt %114 : vector<16x1xf32>
    %116 = vector.broadcast %115 : vector<16x1xf32> to vector<16x32xf32>
    %117 = arith.mulf %107, %116 : vector<16x32xf32>
    %118 = vector.broadcast %100 : vector<1x32xf32> to vector<16x32xf32>
    %119 = arith.mulf %117, %118 : vector<16x32xf32>
    %120 = vector.broadcast %101 : vector<1x32xf32> to vector<16x32xf32>
    %121 = arith.addf %119, %120 : vector<16x32xf32>
    %122 = arith.truncf %121 : vector<16x32xf32> to vector<16x32xbf16>
    %c0_45 = arith.constant 0 : index
    %c0_46 = arith.constant 0 : index
    %123 = vector.load %arg8[%c0_45, %c0_46] : memref<32x32xbf16, #tpu.memory_space<vmem>>, vector<32x32xbf16>
    %cst_47 = arith.constant dense<0.000000e+00> : vector<16x32xf32>
    %124 = tpu.matmul %122, %123, %cst_47 {dimension_numbers = #tpu.dot_dimension_numbers<[1], [0], [0], [1], [0, 0, 1, 1], [], []>} : vector<16x32xbf16>, vector<32x32xbf16>, vector<16x32xf32> -> vector<16x32xf32>
    %125 = arith.addf %73, %124 : vector<16x32xf32>
    %c5 = arith.constant 5 : index
    %c0_48 = arith.constant 0 : index
    %126 = vector.load %arg4[%c5, %c0_48] : memref<8x32xf32, #tpu.memory_space<vmem>>, vector<1x32xf32>
    %127 = vector.broadcast %126 : vector<1x32xf32> to vector<16x32xf32>
    %128 = arith.addf %125, %127 : vector<16x32xf32>
    %cst_49 = arith.constant 0.000000e+00 : f32
    %129 = vector.broadcast %cst_49 : f32 to vector<16x32xf32>
    %130 = arith.maximumf %128, %129 : vector<16x32xf32>
    %c6 = arith.constant 6 : index
    %c0_50 = arith.constant 0 : index
    %131 = vector.load %arg4[%c6, %c0_50] : memref<8x32xf32, #tpu.memory_space<vmem>>, vector<1x32xf32>
    %c7 = arith.constant 7 : index
    %c0_51 = arith.constant 0 : index
    %132 = vector.load %arg4[%c7, %c0_51] : memref<8x32xf32, #tpu.memory_space<vmem>>, vector<1x32xf32>
    %cst_52 = arith.constant dense<0.000000e+00> : vector<16xf32>
    %133 = vector.multi_reduction <add>, %130, %cst_52 [1] : vector<16x32xf32> to vector<16xf32>
    %134 = vector.shape_cast %133 : vector<16xf32> to vector<16x1xf32>
    %cst_53 = arith.constant 3.200000e+01 : f32
    %135 = vector.broadcast %cst_53 : f32 to vector<16x1xf32>
    %136 = arith.divf %134, %135 : vector<16x1xf32>
    %137 = vector.broadcast %136 : vector<16x1xf32> to vector<16x32xf32>
    %138 = arith.subf %130, %137 : vector<16x32xf32>
    %139 = arith.mulf %138, %138 : vector<16x32xf32>
    %cst_54 = arith.constant dense<0.000000e+00> : vector<16xf32>
    %140 = vector.multi_reduction <add>, %139, %cst_54 [1] : vector<16x32xf32> to vector<16xf32>
    %141 = vector.shape_cast %140 : vector<16xf32> to vector<16x1xf32>
    %cst_55 = arith.constant 3.200000e+01 : f32
    %142 = vector.broadcast %cst_55 : f32 to vector<16x1xf32>
    %143 = arith.divf %141, %142 : vector<16x1xf32>
    %cst_56 = arith.constant 9.99999974E-6 : f32
    %144 = vector.broadcast %cst_56 : f32 to vector<16x1xf32>
    %145 = arith.addf %143, %144 : vector<16x1xf32>
    %146 = math.rsqrt %145 : vector<16x1xf32>
    %147 = vector.broadcast %146 : vector<16x1xf32> to vector<16x32xf32>
    %148 = arith.mulf %138, %147 : vector<16x32xf32>
    %149 = vector.broadcast %131 : vector<1x32xf32> to vector<16x32xf32>
    %150 = arith.mulf %148, %149 : vector<16x32xf32>
    %151 = vector.broadcast %132 : vector<1x32xf32> to vector<16x32xf32>
    %152 = arith.addf %150, %151 : vector<16x32xf32>
    %c0_57 = arith.constant 0 : index
    %c0_58 = arith.constant 0 : index
    %153 = vector.load %arg9[%c0_57, %c0_58] : memref<16x32xf32, #tpu.memory_space<vmem>>, vector<16x32xf32>
    tpu.vector_store %arg9[%c0_57, %c0_58], %152 {strides = array<i32>} : memref<16x32xf32, #tpu.memory_space<vmem>>, vector<16x32xf32>,
    return
  }
  func.func @transform_0(%arg0: i32) -> (i32, i32) {
    %c0_i32 = arith.constant 0 : i32
    %c0_i32_0 = arith.constant 0 : i32
    return %arg0, %c0_i32 : i32, i32
  }
  func.func @transform_1(%arg0: i32) -> (i32, i32) {
    %c0_i32 = arith.constant 0 : i32
    %c0_i32_0 = arith.constant 0 : i32
    return %arg0, %c0_i32 : i32, i32
  }
  func.func @transform_2(%arg0: i32) -> (i32, i32) {
    %c0_i32 = arith.constant 0 : i32
    %c0_i32_0 = arith.constant 0 : i32
    %c0_i32_1 = arith.constant 0 : i32
    return %c0_i32, %c0_i32_0 : i32, i32
  }
  func.func @transform_3(%arg0: i32) -> (i32, i32) {
    %c0_i32 = arith.constant 0 : i32
    %c0_i32_0 = arith.constant 0 : i32
    %c0_i32_1 = arith.constant 0 : i32
    return %c0_i32, %c0_i32_0 : i32, i32
  }
  func.func @transform_4(%arg0: i32) -> (i32, i32) {
    %c0_i32 = arith.constant 0 : i32
    %c0_i32_0 = arith.constant 0 : i32
    %c0_i32_1 = arith.constant 0 : i32
    return %c0_i32, %c0_i32_0 : i32, i32
  }
  func.func @transform_5(%arg0: i32) -> (i32, i32) {
    %c0_i32 = arith.constant 0 : i32
    %c0_i32_0 = arith.constant 0 : i32
    %c0_i32_1 = arith.constant 0 : i32
    return %c0_i32, %c0_i32_0 : i32, i32
  }
  func.func @transform_6(%arg0: i32) -> (i32, i32) {
    %c0_i32 = arith.constant 0 : i32
    %c0_i32_0 = arith.constant 0 : i32
    %c0_i32_1 = arith.constant 0 : i32
    return %c0_i32, %c0_i32_0 : i32, i32
  }
  func.func @transform_7(%arg0: i32) -> (i32, i32) {
    %c0_i32 = arith.constant 0 : i32
    %c0_i32_0 = arith.constant 0 : i32
    %c0_i32_1 = arith.constant 0 : i32
    return %c0_i32, %c0_i32_0 : i32, i32
  }
  func.func @transform_8(%arg0: i32) -> (i32, i32) {
    %c0_i32 = arith.constant 0 : i32
    %c0_i32_0 = arith.constant 0 : i32
    return %arg0, %c0_i32 : i32, i32
  }
}

</mosaic_0001>

<bundles_post_ra>
// kernel: tpu_custom_call.1
= control target key start
LH: loop header
LB: loop body
LE: loop exit
PB: predicated region body
PF: predicated region fallthrough
CT: control target
= control target key end

     0   :  { %13 = vsyncpa [#allocation4], 0  ;;  %s2312_s0 = inlined_call_operand.vmem [shape: f32[32,32], index: 0, kind: input, shape index: {}]   ;;  %s2313_s1 = inlined_call_operand.vmem [shape: f32[32,32], index: 1, kind: input, shape index: {}]   ;;  %s2314_s2 = inlined_call_operand.vmem [shape: bf16[96,32], index: 2, kind: input, shape index: {}]   ;;  %s2315_s3 = inlined_call_operand.hbm [shape: f32[8,32], index: 3, kind: input, shape index: {}]   ;;  %s2316_s4 = inlined_call_operand.vmem [shape: bf16[32,160], index: 4, kind: input, shape index: {}]   ;;  %s2317_s5 = inlined_call_operand.vmem [shape: bf16[32,256], index: 5, kind: input, shape index: {}]   ;;  %s2318_s6 = inlined_call_operand.vmem [shape: bf16[128,32], index: 6, kind: input, shape index: {}]   ;;  %s2319_s7 = inlined_call_operand.vmem [shape: bf16[32,32], index: 7, kind: input, shape index: {}]   ;;  %s2320_s8 = inlined_call_operand.hbm [shape: f32[32,32], index: 8, kind: output, shape index: {}]  }
   0x1   :  { %14 = vsyncpa [#allocation5], 0 }
   0x2   :  { %16 = vsyncpa [#allocation5 + $0x1], 0  ;;  %s1913_s27 = smov 0   ;;  %s1915_s28 = smov 0  }
   0x3   :  { %s1917_s29 = smov 0   ;;  %s1919_s30 = smov 0  }
   0x4 LB: > { %s1934_s9 = sadd.s32 4294967295, %s1857_s30   ;;  %s1412_s10 = sadd.s32 4294967294, %s1857_s30   ;;  %s1857_s30 = sphi %s1919_s30, %s2338_s30   ;;  %s1853_s29 = sphi %s1917_s29, %s2337_s29   ;;  %s1849_s28 = sphi %s1915_s28, %s2336_s28   ;;  %s1845_s27 = sphi %s1913_s27, %s2335_s27  }
   0x5   : > { %s1938_s11 = sadd.s32 1, %s1857_s30   ;;  %s207_s12 = sadd.s32 1, %s1853_s29 }
   0x6   : > { %s204_s13 = ssub.s32 %s1857_s30, %s1938_s11  ;;  %p217_p0 = scmp.ne.s32.totalorder %s1853_s29, %s1849_s28 }
   0x7   : > { %p205_p1 = scmp.eq.s32.totalorder %s204_s13, 0  ;;  %p218_p2 = scmp.eq.s32.totalorder %s1934_s9, 1 }
   0x8   : > { %p223_p3 = scmp.ne.s32.totalorder %s1849_s28, %s1845_s27  ;;  %p224_p4 = scmp.eq.s32.totalorder %s1412_s10, 1 }
   0x9   : > { %s1949_s14 = scalar_select %p205_p1, %s1853_s29, %s207_s12  }
   0xa   : > { %p1951_p5 = por %p218_p2, %p217_p0  ;;  %p1955_p6 = por %p224_p4, %p223_p3 }
   0xb   : > { %p1413_p7 = scmp.ge.s32.totalorder %s1857_s30, 1  ;;  %p231_p8 = scmp.lt.s32.totalorder %s1857_s30, 3 }
   0xc   : > { %s2324_s15 = scalar_select %p1951_p5, 1, 0 }
   0xd   : > { %s2325_s16 = scalar_select %p1955_p6, 1, 0 }
   0xe   : > { %p2321_p9 = scmp.eq.s32.totalorder %s1934_s9, 0  ;;  %p1962_p10 = pnand %p1413_p7, %p231_p8 }
   0xf   : > { %s1859_s18 = smov [#allocation3]   ;;  %s1763_s23 = scalar_lea.hbm %s2315_s3, 128 }
  0x10   : > { %s2326_s17 = scalar_select %p1962_p10, 1, 0 }
  0x11   : > { %s247_s19 = sshll.u32 %s1859_s18, 4  ;;  %p1598_p11 = pneg %p1962_p10  ;;  %s248_s19 = int_to_ptr.vmem [resolvable:$true] %s247_s19 }
  0x12   : > { %p1764_p13 = scmp.ne.s32.totalorder %s2315_s3, %s1763_s23  ;;  %p1770_p3 = scmp.lt.u32.totalorder %s1763_s23, %s2315_s3 }
  0x13   : > { %p1970_p12 = pnand %p2321_p9, %p1598_p11 }
  0x15   : > { %p1765_p0 = pneg %p1970_p12 }
  0x17   : > { %p1766_p1 = pnand %p1765_p0, %p1764_p13 }
  0x19   : > { %p1767_p2 = pneg %p1766_p1 }
  0x1b   : > { %p1772_p4 = pnand %p1770_p3, %p1767_p2 }
  0x1d   : > { %1775 = shalt.err (!%p1772_p4)
}
  0x1e   : > { %s1776_s12 = scalar_lea.vmem %s248_s19, 128  ;;  %p1784_p9 = scmp.lt.s32.totalorder %s248_s19, %s248_s19 }
  0x1f   : > { %p1777_p7 = scmp.ne.s32.totalorder %s248_s19, %s1776_s12  ;;  %p1785_p6 = scmp.lt.s32.totalorder %s1776_s12, %s1776_s12 }
  0x21   : > { %p1779_p8 = pnand %p1777_p7, %p1765_p0  ;;  %p1786_p5 = por %p1785_p6, %p1784_p9 }
  0x23   : > { %p1780_p11 = pneg %p1779_p8 }
  0x25   : > { %p1787_p10 = pnand %p1786_p5, %p1780_p11 }
  0x27   : > { %1790 = shalt.err (!%p1787_p10)
}
  0x28   : > { %1601 = dma.hbm_to_vmem [thread:$0]  (!%p1970_p12), %s2315_s3, 128, %s248_s19, [#allocation4]  }
  0x29   : > { %p2328_p13 = scmp.ne.s32.totalorder %s2326_s17, 0 }
  0x2a   : > { %p2329_p1 = scmp.eq.s32.totalorder (!%p2328_p13), %s1934_s9, 0 }
  0x2b   : > { %290 = sbr.rel (%p2328_p13) target bundleno = 2932 (0xb74), region = 52 }
  0x32   : > { %1836 = dma.done.wait (%p2329_p1), [#allocation4], 128   ;;  %p2330_p0 = pmov %p2329_p1 }
  0x33   : > { %s1419_s21 = sshll.u32 %s1934_s9, 1  ;;  %v347_v0 = vlaneseq  ;;  %v1860_v1 = vmov 0.0   ;;  %vm1861_vm0 = vmmov 0   ;;  %vm394_vm1 = vcmask 1046528   ;;  %v1659_v14 = vld [vmem:[%s2314_s2] sm:$0xff]   ;;  %s1862_s25 = smov 32  }
  0x34   : > { %1838 = vsyncadd (%p2330_p0), [#allocation4], 4294967168  ;;  %p330_p5 = scmp.lt.s32.totalorder %s1419_s21, 3  ;;  %1510 = vmatprep.subr.bf16.mxu0 %v1860_v1  ;;  %1522 = vmatprep.mubr.msk.bf16.mxu0 %vm1861_vm0, %v1860_v1  ;;  %vm380_vm3 = vcmask 1040384   ;;  %v1660_v19 = vld [vmem:[%s2314_s2 + $0x8] sm:$0xff]   ;;  %v1661_v23 = vld [vmem:[%s2314_s2 + $0x10] sm:$0xff]  }
  0x35   : > { %v348_v2 = vshrl.u32 %v347_v0, 7  ;;  %1511 = vmatpush3.bf16.msra.mxu0 %v1659_v14  ;;  %s1863_s18 = smov 64   ;;  %v1662_v24 = vld [vmem:[%s2314_s2 + $0x18] sm:$0xff]   ;;  %v1663_v25 = vld [vmem:[%s2314_s2 + $0x20] sm:$0xff]   ;;  %v1664_v26 = vld [vmem:[%s2314_s2 + $0x28] sm:$0xff]   ;;  %vm422_vm5 = vcmask 261120  }
  0x36   : > { %s2340_s21 = smov (!%p330_p5, %s1419_s21), 3  ;;  %1512 = vmatprep.subr.bf16.mxu0 %v1860_v1  ;;  %vm425_vm6 = vcmask 523264   ;;  %vm482_vm7 = vcmask 785408   ;;  %v1423_v38 = vld [vmem:[#allocation3] ss:$0 sm:$0xff]  ;;  %v1864_v63 = vmov 0  }
  0x37   : > { %v349_v3 = vadd.s32 8, %v348_v2  ;;  %v354_v4 = vand.u32 15, %v348_v2  ;;  %s1420_s17 = sshll.u32 %s2340_s21, 3  ;;  %v1665_v59 = vld [vmem:[%s2316_s4 + $0x4] ss:$8 sps:$4 sm:$0xff]   ;;  %631 = vmatprep.mubr.bf16.mxu1 %v1864_v63  ;;  %vm731_vm8 = vcmask 130048  }
  0x38   : > { %s333_s22 = scalar_lea.vmem %s2312_s0, %s1420_s17  ;;  %v1667_v60 = vld [vmem:[%s2316_s4] ss:$8 sps:$4 sm:$0xff]   ;;  %599 = vmatprep.subr.bf16.mxu1 %v1665_v59  ;;  %v1668_v61 = vld [vmem:[%s2316_s4 + $0x14] ss:$8 sps:$4 sm:$0xff]   ;;  %v1670_v62 = vld [vmem:[%s2316_s4 + $0x10] ss:$8 sps:$4 sm:$0xff]   ;;  %s339_s13 = scalar_lea.vmem %s2313_s1, %s1420_s17 }
  0x39   : > { %v361_v5 = vand.u32 15, %v349_v3  ;;  %v343_v6 = vld [vmem:[%s333_s22] sm:$0xff]  ;;  %v344_v7 = vld [vmem:[%s333_s22 + $0x8] sm:$0xff]  ;;  %vm2008_vm2 = vcmp.eq.s32.totalorder %v354_v4, 0  ;;  %1513 = vmatpush3.bf16.msra.mxu0 %v1660_v19  ;;  %600 = vmatpush1.bf16.msra.mxu1 %v1667_v60  ;;  %s326_s12 = sand.u32 1, %s1849_s28   ;;  %p2333_p9 = scmp.ne.s32.totalorder %s2324_s15, 0 }
  0x3a   : > { %v377_v9 = vrot.slane %v344_v7, 7  ;;  %v396_v10 = vrot.slane %v344_v7, 1  ;;  %v1649_v11 = vpack.i.bf16 %v344_v7, %v343_v6  ;;  %v381_v12 = vrot.slane %v343_v6, 7  ;;  %1514 = vmatprep.subr.bf16.mxu0 %v1860_v1  ;;  %601 = vmatprep.subr.bf16.mxu1 %v1668_v61  ;;  %v1673_v0 = vld [vmem:[%s2317_s5 + $0x4] ss:$8 sps:$4 sm:$0xff]   ;;  %s1865_s24 = smov [#allocation6]  }
  0x3b   : > { %v395_v13 = vrot.slane %v343_v6, 1  ;;  %vm393_vm4 = vcmp.eq.s32.totalorder %v361_v5, 15  ;;  %v1432_v14 = vld [vmem:[#allocation3 + $0x2] ss:$0 sm:$0xff] }
  0x3c   : > { %1650 = vrot.lane.b32.xlu0 %v1649_v11, %s1862_s25  ;;  %v382_v15 = vsel %vm380_vm3, %v381_v12, %v377_v9  ;;  %v385_v16 = vsel %vm380_vm3, %v377_v9, %v381_v12  ;;  %s1795_s25 = sshll.u32 %s1865_s24, 4  ;;  %s1796_s25 = int_to_ptr.vmem [resolvable:$false] %s1795_s25 }
  0x3d   : > { %v397_v17 = vsel %vm394_vm1, %v395_v13, %v396_v10  ;;  %v401_v18 = vsel %vm394_vm1, %v396_v10, %v395_v13  ;;  %v390_v20 = vsel %vm2008_vm2, 0.0, %v385_v16  ;;  %1515 = vmatpush3.bf16.msra.mxu0 %v1661_v23  ;;  %602 = vmatpush1.bf16.msra.mxu1 %v1670_v62  ;;  %v1431_v10 = vld [vmem:[#allocation3 + $0x1] ss:$0 sm:$0xff]  ;;  %v1674_v23 = vld [vmem:[%s2317_s5 + $0x10] ss:$8 sps:$4 sm:$0xff]   ;;  %s1797_s26 = scalar_lea.vmem %s1796_s25, 512 }
  0x3e   : > { %v407_v21 = vsel %vm393_vm4, 0.0, %v401_v18  ;;  %1516 = vmatprep.subr.bf16.mxu0 %v1860_v1  ;;  %669 = vmatprep.subr.bf16.mxu1 %v1673_v0  ;;  %v1671_v18 = vld [vmem:[%s2317_s5] ss:$8 sps:$4 sm:$0xff]  }
  0x3f   : > { %v1654_v22 = vpack.i.bf16 %v407_v21, %v397_v17  ;;  %v2073_v21 = vld [vmem:[%s339_s13] sm:$0xff] }
  0x41   : > { %1655 = vrot.lane.b32.xlu0 %v1654_v22, %s1863_s18  ;;  %1517 = vmatpush3.bf16.msra.mxu0 %v1662_v24  ;;  %v2075_v22 = vld [vmem:[%s339_s13 + $0x8] sm:$0xff]  ;;  %s1418_s13 = sshll.u32 %s326_s12, 4  ;;  %s1472_s18 = sshll.u32 %s1934_s9, 8 }
  0x42   : > { %1518 = vmatprep.subr.bf16.mxu0 %v1860_v1  ;;  %v571_v24 = vpack.c.bf16 %v2075_v22, %v2073_v21  ;;  %s328_s19 = scalar_lea.vmem [#allocation6], %s1418_s13  ;;  %s2265_s17 = scalar_lea.hbm %s2320_s8, %s1472_s18 }
  0x43   : > { %s1326_s20 = sshll.u32 %s328_s19, 4  ;;  %s2271_s9 = scalar_lea.sflag [#allocation5], %s326_s12  ;;  %s2267_s20 = int_to_ptr.vmem [resolvable:$true] %s1326_s20 }
  0x44   : > { %s1791_s23 = scalar_lea.vmem %s2267_s20, 256  ;;  %p1798_p2 = scmp.lt.s32.totalorder %s2267_s20, %s1796_s25 }
  0x45   : > { %1519 = vmatpush3.bf16.msra.mxu0 %v1663_v25  ;;  %p1792_p6 = scmp.ne.s32.totalorder %s2267_s20, %s1791_s23  ;;  %p1799_p3 = scmp.lt.s32.totalorder %s1797_s26, %s1791_s23 }
  0x46   : > { %1520 = vmatprep.subr.bf16.mxu0 %v1860_v1 }
  0x47   : > { %p1793_p10 = pnand %p1792_p6, %p2333_p9  ;;  %p1800_p4 = por %p1799_p3, %p1798_p2 }
  0x49   : > { %1521 = vmatpush3.bf16.msra.mxu0 %v1664_v26  ;;  %p1794_p12 = pneg %p1793_p10 }
  0x4a   : > { %1544 = vmatprep.subr.bf16.mxu0 %v1860_v1 }
  0x4b   : > { %p1801_p7 = pnand %p1800_p4, %p1794_p12 }
  0xae   : > { %v1651_v27 = vpop.permute.xlu0 %1650 }
  0xaf   : > { %v1653_v28 = vunpack.i.h.bf16 %v1651_v27  ;;  %v1652_v29 = vunpack.i.l.bf16 %v1651_v27 }
  0xb1   : > { %v423_v33 = vsel %vm422_vm5, %v390_v20, %v1652_v29  ;;  %v424_v34 = vsel %vm422_vm5, %v382_v15, %v1653_v28  ;;  %v1676_v20 = vld [vmem:[%s2317_s5 + $0x14] ss:$8 sps:$4 sm:$0xff]  }
  0xb3   : > { %v1656_v30 = vpop.permute.xlu0 %1655 }
  0xb4   : > { %v1658_v31 = vunpack.i.h.bf16 %v1656_v30  ;;  %v1657_v32 = vunpack.i.l.bf16 %v1656_v30 }
  0xb6   : > { %v426_v35 = vsel %vm425_vm6, %v423_v33, %v1657_v32  ;;  %v427_v36 = vsel %vm425_vm6, %v424_v34, %v1658_v31 }
  0xb7   : > { %v428_v37 = vpack.c.bf16 %v427_v36, %v426_v35 }
  0xb9   : > { %1523 = vmatmul.mubr.msk.bf16.vlgmr.msra.gmra.mrb[0].mxu0 %vm482_vm7, %v428_v37 }
  0xba   : > { %1560 = vmatprep.mubr.msk.bf16.mxu0 %vm1861_vm0, %v1860_v1 }
 0x18c   : > { %v520_v39 = vpop.f32.mrb[0].mxu0 }
 0x18d   : > { %v521_v40 = vadd.f32 %v1423_v38, %v520_v39  ;;  %v1524_v41 = vpop.f32.mrb[1].mxu0 }
 0x18e   : > { %v523_v42 = vpop.f32.mrb[2].mxu0 }
 0x18f   : > { %v527_v43 = vmax.f32 %v521_v40, 0.0  ;;  %v524_v44 = vadd.f32 %v1423_v38, %v523_v42  ;;  %v1525_v45 = vpop.f32.mrb[3].mxu0 }
 0x191   : > { %v528_v46 = vmax.f32 %v524_v44, 0.0  ;;  %v531_v47 = vsel %vm422_vm5, %v527_v43, 0.0 }
 0x192   : > { %532 = vadd.xlane.f32.xlu1 %v531_v47 }
 0x193   : > { %v534_v48 = vsel %vm422_vm5, %v528_v46, 0.0 }
 0x196   : > { %535 = vadd.xlane.f32.xlu1 %v534_v48 }
 0x21f   : > { %v533_v49 = vpop.xlane.xlu1 %532 }
 0x220   : > { %v538_v50 = vmul.f32 0.03125, %v533_v49 }
 0x222   : > { %v540_v51 = vsub.f32 %v527_v43, %v538_v50 }
 0x223   : > { %v536_v52 = vpop.xlane.xlu1 %535 }
 0x224   : > { %v539_v53 = vmul.f32 0.03125, %v536_v52  ;;  %v542_v54 = vmul.f32 %v540_v51, %v540_v51 }
 0x226   : > { %v541_v55 = vsub.f32 %v528_v46, %v539_v53  ;;  %v544_v56 = vsel %vm422_vm5, %v542_v54, 0.0 }
 0x227   : > { %545 = vadd.xlane.f32.xlu0 %v544_v56 }
 0x228   : > { %v543_v57 = vmul.f32 %v541_v55, %v541_v55 }
 0x22a   : > { %v547_v58 = vsel %vm422_vm5, %v543_v57, 0.0 }
 0x22b   : > { %548 = vadd.xlane.f32.xlu1 %v547_v58 }
 0x2b4   : > { %v546_v2 = vpop.xlane.xlu0 %545 }
 0x2b5   : > { %v550_v3 = vmul.f32 0.03125, %v546_v2 }
 0x2b7   : > { %v552_v4 = vadd.f32 1e-05, %v550_v3 }
 0x2b8   : > { %v549_v5 = vpop.xlane.xlu1 %548 }
 0x2b9   : > { %1687 = vrsqrt.f32 %v552_v4  ;;  %v551_v6 = vmul.f32 0.03125, %v549_v5 }
 0x2bb   : > { %v553_v7 = vadd.f32 1e-05, %v551_v6 }
 0x2bd   : > { %1689 = vrsqrt.f32 %v553_v7 }
 0x2c3   : > { %v1688_v8 = vpop.eup %1687 }
 0x2c4   : > { %v556_v9 = vmul.f32 %v1688_v8, %v540_v51 }
 0x2c6   : > { %v562_v13 = vmul.f32 %v1431_v10, %v556_v9 }
 0x2c7   : > { %v1690_v11 = vpop.eup %1689 }
 0x2c8   : > { %v557_v12 = vmul.f32 %v1690_v11, %v541_v55  ;;  %v568_v16 = vadd.f32 %v1432_v14, %v562_v13 }
 0x2ca   : > { %v563_v15 = vmul.f32 %v1431_v10, %v557_v12 }
 0x2cc   : > { %v569_v17 = vadd.f32 %v1432_v14, %v563_v15 }
 0x2ce   : > { %v570_v19 = vpack.c.bf16 %v569_v17, %v568_v16 }
 0x2d0   : > { %1437 = vmatmul.mubr.msk.bf16.vlgmr.msra.gmra.mrb[0].mxu1 %vm422_vm5, %v570_v19 }
 0x2d1   : > { %670 = vmatpush1.bf16.msra.mxu1 %v1671_v18  ;;  %701 = vmatprep.mubr.bf16.mxu1 %v1864_v63 }
 0x2d2   : > { %671 = vmatprep.subr.bf16.mxu1 %v1676_v20 }
 0x2d5   : > { %672 = vmatpush1.bf16.msra.mxu1 %v1674_v23 }
 0x2d8   : > { %1442 = vmatmul.mubr.msk.bf16.vlgmr.msra.gmra.mrb[4].mxu1 %vm422_vm5, %v571_v24 }
 0x3a3   : > { %v633_v25 = vpop.f32.mrb[0].mxu1 }
 0x3a4   : > { %v2083_v26 = vpop.f32.mrb[1].mxu1 }
 0x3a5   : > { %v637_v27 = vpop.f32.mrb[2].mxu1 }
 0x3a6   : > { %v712_v28 = vpack.c.bf16 %v637_v27, %v633_v25  ;;  %v2085_v29 = vpop.f32.mrb[3].mxu1 }
 0x3a8   : > { %715 = vxpose.xlu1.c.b16.start.end [1/1] (short) %v712_v28, 128 }
 0x3ab   : > { %v703_v30 = vpop.f32.mrb[4].mxu1 }
 0x3ac   : > { %v2087_v31 = vpop.f32.mrb[5].mxu1 }
 0x3ad   : > { %v707_v32 = vpop.f32.mrb[6].mxu1 }
 0x3ae   : > { %v713_v33 = vpack.c.bf16 %v707_v32, %v703_v30  ;;  %v2089_v34 = vpop.f32.mrb[7].mxu1 }
 0x3af   : > { %v714_v35 = vpack.c.bf16 %v2089_v34, %v2087_v31 }
 0x3b0   : > { %1526 = vmatprep.subr.bf16.mxu1 %v713_v33 }
 0x3b1   : > { %1527 = vmatpush3.bf16.msra.mxu1 %v713_v33 }
 0x3b2   : > { %1564 = vmatprep.subr.bf16.mxu1 %v1860_v1 }
 0x40e   : > { %v723_v36 = vpop.trf.xlu1 }
 0x40f   : > { %1528 = vmatprep.mubr.msk.bf16.mxu1 %vm731_vm8, %v723_v36 }
 0x412   : > { %v724_v37 = vpop.trf.xlu1 }
 0x413   : > { %1529 = vmatmul.mubr.msk.bf16.vlgmr.msra.gmra.mrb[8].mxu1 %vm731_vm8, %v724_v37 }
 0x416   : > { %v725_v38 = vpop.trf.xlu1 }
 0x417   : > { %1532 = vmatprep.mubr.msk.bf16.mxu1 %vm731_vm8, %v725_v38 }
 0x41a   : > { %v726_v39 = vpop.trf.xlu1 }
 0x41b   : > { %1533 = vmatmul.mubr.msk.bf16.gmra.mrb[12].mxu1 %vm731_vm8, %v726_v39 }
 0x41e   : > { %v727_v40 = vpop.trf.xlu1 }
 0x41f   : > { %1536 = vmatprep.mubr.msk.bf16.mxu1 %vm731_vm8, %v727_v40 }
 0x422   : > { %v728_v41 = vpop.trf.xlu1 }
 0x423   : > { %1537 = vmatmul.mubr.msk.bf16.gmra.mrb[16].mxu1 %vm731_vm8, %v728_v41 }
 0x426   : > { %v729_v42 = vpop.trf.xlu1 }
 0x427   : > { %1540 = vmatprep.mubr.msk.bf16.mxu1 %vm731_vm8, %v729_v42 }
 0x42a   : > { %v730_v43 = vpop.trf.xlu1 }
 0x42b   : > { %1541 = vmatmul.mubr.msk.bf16.gmra.mrb[20].mxu1 %vm731_vm8, %v730_v43 }
 0x42c   : > { %1580 = vmatprep.mubr.msk.bf16.mxu1 %vm1861_vm0, %v1860_v1 }
 0x4e6   : > { %v1530_v44 = vpop.f32.mrb[8].mxu1 }
 0x4e7   : > { %v790_v45 = vpop.f32.mrb[9].mxu1 }
 0x4e8   : > { %853 = vmax.xlane.f32.xlu0 %v790_v45  ;;  %v1531_v46 = vpop.f32.mrb[10].mxu1 }
 0x4e9   : > { %v793_v47 = vpop.f32.mrb[11].mxu1 }
 0x4ec   : > { %855 = vmax.xlane.f32.xlu0 %v793_v47 }
 0x4ee   : > { %v1534_v48 = vpop.f32.mrb[12].mxu1 }
 0x4ef   : > { %v806_v49 = vpop.f32.mrb[13].mxu1 }
 0x4f0   : > { %857 = vmax.xlane.f32.xlu0 %v1530_v44  ;;  %v1535_v50 = vpop.f32.mrb[14].mxu1 }
 0x4f1   : > { %v809_v51 = vpop.f32.mrb[15].mxu1 }
 0x4f2   : > { %863 = vmax.xlane.f32.xlu1 %v809_v51 }
 0x4f4   : > { %859 = vmax.xlane.f32.xlu0 %v1531_v46 }
 0x4f6   : > { %v2104_v52 = vpop.f32.mrb[16].mxu1 }
 0x4f7   : > { %v822_v53 = vpop.f32.mrb[17].mxu1 }
 0x4f8   : > { %861 = vmax.xlane.f32.xlu0 %v806_v49  ;;  %v2106_v54 = vpop.f32.mrb[18].mxu1 }
 0x4f9   : > { %v2108_v55 = vpop.f32.mrb[19].mxu1 }
 0x4fc   : > { %865 = vmax.xlane.f32.xlu0 %v1534_v48 }
 0x4fe   : > { %v2110_v56 = vpop.f32.mrb[20].mxu1 }
 0x4ff   : > { %v2112_v57 = vpop.f32.mrb[21].mxu1 }
 0x500   : > { %867 = vmax.xlane.f32.xlu0 %v1535_v50  ;;  %v2114_v58 = vpop.f32.mrb[22].mxu1 }
 0x501   : > { %v2116_v59 = vpop.f32.mrb[23].mxu1 }
 0x504   : > { %869 = vmax.xlane.f32.xlu0 %v822_v53 }
 0x508   : > { %871 = vmax.xlane.f32.xlu0 %v2108_v55 }
 0x50c   : > { %873 = vmax.xlane.f32.xlu0 %v2104_v52 }
 0x510   : > { %875 = vmax.xlane.f32.xlu0 %v2106_v54 }
 0x514   : > { %877 = vmax.xlane.f32.xlu0 %v2112_v57 }
 0x518   : > { %879 = vmax.xlane.f32.xlu0 %v2116_v59 }
 0x51c   : > { %881 = vmax.xlane.f32.xlu0 %v2110_v56 }
 0x520   : > { %883 = vmax.xlane.f32.xlu0 %v2114_v58 }
 0x575   : > { %v854_v60 = vpop.xlane.xlu0 %853 }
 0x576   : > { %v885_v61 = vsub.f32 %v790_v45, %v854_v60 }
 0x578   : > { %v901_v62 = vmul.f32 1.442695, %v885_v61 }
 0x579   : > { %v856_v63 = vpop.xlane.xlu0 %855 }
 0x57a   : > { %1691 = vpow2.f32 %v901_v62  ;;  %v886_v0 = vsub.f32 %v793_v47, %v856_v63 }
 0x57c   : > { %v903_v2 = vmul.f32 1.442695, %v886_v0 }
 0x57d   : > { %v858_v3 = vpop.xlane.xlu0 %857 }
 0x57e   : > { %1693 = vpow2.f32 %v903_v2  ;;  %v887_v4 = vsub.f32 %v1530_v44, %v858_v3 }
 0x57f   : > { %v864_v5 = vpop.xlane.xlu1 %863 }
 0x580   : > { %v905_v6 = vmul.f32 1.442695, %v887_v4  ;;  %v890_v7 = vsub.f32 %v809_v51, %v864_v5 }
 0x581   : > { %v860_v8 = vpop.xlane.xlu0 %859 }
 0x582   : > { %1695 = vpow2.f32 %v905_v6  ;;  %v888_v9 = vsub.f32 %v1531_v46, %v860_v8  ;;  %v911_v12 = vmul.f32 1.442695, %v890_v7  ;;  %v1678_v6 = vld [vmem:[%s2318_s6 + $0x8] sm:$0xff]   ;;  %v1679_v7 = vld [vmem:[%s2318_s6 + $0x10] sm:$0xff]   ;;  %v1680_v8 = vld [vmem:[%s2318_s6 + $0x18] sm:$0xff]  }
 0x584   : > { %v2125_v10 = vpop.eup %1691  ;;  %v907_v11 = vmul.f32 1.442695, %v888_v9  ;;  %v1681_v9 = vld [vmem:[%s2318_s6 + $0x20] sm:$0xff]  }
 0x585   : > { %v862_v13 = vpop.xlane.xlu0 %861  ;;  %933 = vadd.xlane.f32.xlu1 %v2125_v10 }
 0x586   : > { %1697 = vpow2.f32 %v907_v11  ;;  %v889_v14 = vsub.f32 %v806_v49, %v862_v13  ;;  %v1682_v11 = vld [vmem:[%s2318_s6 + $0x28] sm:$0xff]  }
 0x587   : > { %1699 = vpow2.f32 %v911_v12  ;;  %v1683_v12 = vld [vmem:[%s2318_s6 + $0x30] sm:$0xff]  }
 0x588   : > { %v2128_v15 = vpop.eup %1693  ;;  %v909_v16 = vmul.f32 1.442695, %v889_v14 }
 0x589   : > { %v866_v17 = vpop.xlane.xlu0 %865  ;;  %935 = vadd.xlane.f32.xlu0 %v2128_v15 }
 0x58a   : > { %1701 = vpow2.f32 %v909_v16  ;;  %v891_v18 = vsub.f32 %v1534_v48, %v866_v17 }
 0x58c   : > { %v2131_v19 = vpop.eup %1695  ;;  %v913_v20 = vmul.f32 1.442695, %v891_v18 }
 0x58d   : > { %v868_v23 = vpop.xlane.xlu0 %867  ;;  %937 = vadd.xlane.f32.xlu1 %v2131_v19 }
 0x58e   : > { %1703 = vpow2.f32 %v913_v20  ;;  %v892_v24 = vsub.f32 %v1535_v50, %v868_v23 }
 0x590   : > { %v2134_v25 = vpop.eup %1697  ;;  %v915_v27 = vmul.f32 1.442695, %v892_v24 }
 0x591   : > { %v870_v28 = vpop.xlane.xlu0 %869  ;;  %939 = vadd.xlane.f32.xlu0 %v2134_v25  ;;  %v2137_v32 = vpop.eup %1699 }
 0x592   : > { %1705 = vpow2.f32 %v915_v27  ;;  %v893_v30 = vsub.f32 %v822_v53, %v870_v28 }
 0x594   : > { %v2139_v33 = vpop.eup %1701  ;;  %v917_v36 = vmul.f32 1.442695, %v893_v30 }
 0x595   : > { %941 = vadd.xlane.f32.xlu1 %v2139_v33  ;;  %v872_v37 = vpop.xlane.xlu0 %871  ;;  %943 = vadd.xlane.f32.xlu0 %v2137_v32 }
 0x596   : > { %1707 = vpow2.f32 %v917_v36  ;;  %v894_v38 = vsub.f32 %v2108_v55, %v872_v37 }
 0x598   : > { %v2144_v39 = vpop.eup %1703  ;;  %v919_v40 = vmul.f32 1.442695, %v894_v38 }
 0x599   : > { %945 = vadd.xlane.f32.xlu1 %v2144_v39  ;;  %v874_v41 = vpop.xlane.xlu0 %873 }
 0x59a   : > { %1709 = vpow2.f32 %v919_v40  ;;  %v895_v42 = vsub.f32 %v2104_v52, %v874_v41 }
 0x59c   : > { %v2148_v43 = vpop.eup %1705  ;;  %v921_v44 = vmul.f32 1.442695, %v895_v42 }
 0x59d   : > { %v876_v45 = vpop.xlane.xlu0 %875  ;;  %947 = vadd.xlane.f32.xlu0 %v2148_v43 }
 0x59e   : > { %1711 = vpow2.f32 %v921_v44  ;;  %v896_v46 = vsub.f32 %v2106_v54, %v876_v45 }
 0x5a0   : > { %v2152_v47 = vpop.eup %1707  ;;  %v923_v48 = vmul.f32 1.442695, %v896_v46 }
 0x5a1   : > { %949 = vadd.xlane.f32.xlu1 %v2152_v47  ;;  %v878_v49 = vpop.xlane.xlu0 %877 }
 0x5a2   : > { %1713 = vpow2.f32 %v923_v48  ;;  %v897_v50 = vsub.f32 %v2112_v57, %v878_v49 }
 0x5a4   : > { %v2156_v51 = vpop.eup %1709  ;;  %v925_v52 = vmul.f32 1.442695, %v897_v50 }
 0x5a5   : > { %951 = vadd.xlane.f32.xlu0 %v2156_v51  ;;  %v880_v53 = vpop.xlane.xlu0 %879 }
 0x5a6   : > { %1715 = vpow2.f32 %v925_v52  ;;  %v898_v55 = vsub.f32 %v2116_v59, %v880_v53 }
 0x5a8   : > { %v2160_v60 = vpop.eup %1711  ;;  %v927_v54 = vmul.f32 1.442695, %v898_v55 }
 0x5a9   : > { %953 = vadd.xlane.f32.xlu1 %v2160_v60  ;;  %v882_v61 = vpop.xlane.xlu0 %881 }
 0x5aa   : > { %1717 = vpow2.f32 %v927_v54  ;;  %v899_v62 = vsub.f32 %v2110_v56, %v882_v61 }
 0x5ac   : > { %v2164_v63 = vpop.eup %1713  ;;  %v929_v57 = vmul.f32 1.442695, %v899_v62 }
 0x5ad   : > { %955 = vadd.xlane.f32.xlu0 %v2164_v63  ;;  %v884_v0 = vpop.xlane.xlu0 %883 }
 0x5ae   : > { %1719 = vpow2.f32 %v929_v57  ;;  %v900_v2 = vsub.f32 %v2114_v58, %v884_v0  ;;  %v1677_v58 = vld [vmem:[%s2318_s6] sm:$0xff]  }
 0x5af   : > { %1565 = vmatpush3.bf16.msra.mxu1 %v1677_v58 }
 0x5b0   : > { %v2168_v3 = vpop.eup %1715  ;;  %v931_v59 = vmul.f32 1.442695, %v900_v2  ;;  %1566 = vmatprep.subr.bf16.mxu1 %v1860_v1 }
 0x5b1   : > { %957 = vadd.xlane.f32.xlu1 %v2168_v3 }
 0x5b2   : > { %1721 = vpow2.f32 %v931_v59 }
 0x5b3   : > { %1567 = vmatpush3.bf16.msra.mxu1 %v1678_v6 }
 0x5b4   : > { %v2171_v4 = vpop.eup %1717  ;;  %1568 = vmatprep.subr.bf16.mxu1 %v1860_v1 }
 0x5b5   : > { %959 = vadd.xlane.f32.xlu0 %v2171_v4 }
 0x5b7   : > { %1569 = vmatpush3.bf16.msra.mxu1 %v1679_v7 }
 0x5b8   : > { %v2174_v56 = vpop.eup %1719  ;;  %1570 = vmatprep.subr.bf16.mxu1 %v1860_v1 }
 0x5b9   : > { %961 = vadd.xlane.f32.xlu1 %v2174_v56 }
 0x5bb   : > { %1571 = vmatpush3.bf16.msra.mxu1 %v1680_v8 }
 0x5bc   : > { %v2177_v5 = vpop.eup %1721  ;;  %1572 = vmatprep.subr.bf16.mxu1 %v1860_v1 }
 0x5bd   : > { %963 = vadd.xlane.f32.xlu0 %v2177_v5 }
 0x5bf   : > { %1573 = vmatpush3.bf16.msra.mxu1 %v1681_v9 }
 0x5c0   : > { %1574 = vmatprep.subr.bf16.mxu1 %v1860_v1 }
 0x5c3   : > { %1575 = vmatpush3.bf16.msra.mxu1 %v1682_v11 }
 0x5c4   : > { %1576 = vmatprep.subr.bf16.mxu1 %v1860_v1 }
 0x5c7   : > { %1577 = vmatpush3.bf16.msra.mxu1 %v1683_v12 }
 0x5c8   : > { %1578 = vmatprep.subr.bf16.mxu1 %v1860_v1 }
 0x612   : > { %v934_v13 = vpop.xlane.xlu1 %933 }
 0x613   : > { %1723 = vrcp.f32 %v934_v13 }
 0x616   : > { %v936_v14 = vpop.xlane.xlu0 %935 }
 0x617   : > { %1725 = vrcp.f32 %v936_v14 }
 0x61a   : > { %v938_v16 = vpop.xlane.xlu1 %937 }
 0x61b   : > { %1727 = vrcp.f32 %v938_v16 }
 0x61d   : > { %v1724_v18 = vpop.eup %1723 }
 0x61e   : > { %v940_v17 = vpop.xlane.xlu0 %939  ;;  %v981_v27 = vmul.f32 %v1724_v18, %v2125_v10 }
 0x61f   : > { %1729 = vrcp.f32 %v940_v17 }
 0x621   : > { %v1726_v20 = vpop.eup %1725 }
 0x622   : > { %v942_v23 = vpop.xlane.xlu1 %941  ;;  %v944_v24 = vpop.xlane.xlu0 %943  ;;  %v982_v28 = vmul.f32 %v1726_v20, %v2128_v15 }
 0x623   : > { %1731 = vrcp.f32 %v942_v23 }
 0x624   : > { %1733 = vrcp.f32 %v944_v24  ;;  %v997_v30 = vpack.c.bf16 %v982_v28, %v981_v27 }
 0x625   : > { %v1728_v36 = vpop.eup %1727 }
 0x626   : > { %1545 = vmatpush3.bf16.xpose.msra.mxu0 %v997_v30  ;;  %v946_v38 = vpop.xlane.xlu1 %945  ;;  %v983_v41 = vmul.f32 %v1728_v36, %v2131_v19 }
 0x627   : > { %1546 = vmatprep.subr.bf16.mxu0 %v1860_v1 }
 0x629   : > { %v1730_v37 = vpop.eup %1729 }
 0x62a   : > { %v948_v40 = vpop.xlane.xlu0 %947  ;;  %v984_v42 = vmul.f32 %v1730_v37, %v2134_v25 }
 0x62b   : > { %1735 = vrcp.f32 %v948_v40 }
 0x62c   : > { %v998_v44 = vpack.c.bf16 %v984_v42, %v983_v41  ;;  %1737 = vrcp.f32 %v946_v38 }
 0x62d   : > { %v1732_v45 = vpop.eup %1731 }
 0x62e   : > { %v1734_v10 = vpop.eup %1733  ;;  %1547 = vmatpush3.bf16.xpose.msra.mxu0 %v998_v44  ;;  %v985_v15 = vmul.f32 %v1732_v45, %v2139_v33  ;;  %v950_v48 = vpop.xlane.xlu1 %949 }
 0x62f   : > { %1548 = vmatprep.subr.bf16.mxu0 %v1860_v1  ;;  %v986_v46 = vmul.f32 %v1734_v10, %v2137_v32  ;;  %v1685_v10 = vld [vmem:[%s2319_s7] sm:$0xff]  }
 0x631   : > { %v999_v50 = vpack.c.bf16 %v986_v46, %v985_v15  ;;  %v1686_v15 = vld [vmem:[%s2319_s7 + $0x8] sm:$0xff]  }
 0x632   : > { %v952_v49 = vpop.xlane.xlu0 %951 }
 0x633   : > { %1739 = vrcp.f32 %v952_v49 }
 0x634   : > { %1741 = vrcp.f32 %v950_v48 }
 0x635   : > { %v1736_v52 = vpop.eup %1735 }
 0x636   : > { %1549 = vmatpush3.bf16.xpose.msra.mxu0 %v999_v50  ;;  %v1738_v19 = vpop.eup %1737  ;;  %v988_v25 = vmul.f32 %v1736_v52, %v2148_v43  ;;  %v954_v53 = vpop.xlane.xlu1 %953 }
 0x637   : > { %1550 = vmatprep.subr.bf16.mxu0 %v1860_v1  ;;  %v987_v54 = vmul.f32 %v1738_v19, %v2144_v39 }
 0x639   : > { %v1000_v33 = vpack.c.bf16 %v988_v25, %v987_v54 }
 0x63a   : > { %v956_v55 = vpop.xlane.xlu0 %955 }
 0x63b   : > { %1743 = vrcp.f32 %v956_v55 }
 0x63c   : > { %1745 = vrcp.f32 %v954_v53  ;;  %v1459_v53 = vld [vmem:[#allocation3 + $0x3] ss:$0 sm:$0xff] }
 0x63d   : > { %v1740_v61 = vpop.eup %1739 }
 0x63e   : > { %1551 = vmatpush3.bf16.xpose.msra.mxu0 %v1000_v33  ;;  %v1742_v32 = vpop.eup %1741  ;;  %v990_v62 = vmul.f32 %v1740_v61, %v2156_v51  ;;  %v958_v57 = vpop.xlane.xlu1 %957 }
 0x63f   : > { %1552 = vmatprep.subr.bf16.mxu0 %v1860_v1  ;;  %v989_v2 = vmul.f32 %v1742_v32, %v2152_v47  ;;  %v1460_v32 = vld [vmem:[#allocation3 + $0x4] ss:$0 sm:$0xff] }
 0x641   : > { %v1001_v43 = vpack.c.bf16 %v990_v62, %v989_v2 }
 0x642   : > { %v960_v0 = vpop.xlane.xlu0 %959 }
 0x643   : > { %1747 = vrcp.f32 %v960_v0 }
 0x644   : > { %1749 = vrcp.f32 %v958_v57 }
 0x645   : > { %v1744_v59 = vpop.eup %1743 }
 0x646   : > { %1553 = vmatpush3.bf16.xpose.msra.mxu0 %v1001_v43  ;;  %v1746_v39 = vpop.eup %1745  ;;  %v992_v58 = vmul.f32 %v1744_v59, %v2164_v63  ;;  %v962_v6 = vpop.xlane.xlu1 %961  ;;  %v1464_v43 = vld [vmem:[#allocation3 + $0x5] ss:$0 sm:$0xff] }
 0x647   : > { %1554 = vmatprep.subr.bf16.mxu0 %v1860_v1  ;;  %v991_v8 = vmul.f32 %v1746_v39, %v2160_v60 }
 0x649   : > { %v1002_v51 = vpack.c.bf16 %v992_v58, %v991_v8 }
 0x64a   : > { %v964_v7 = vpop.xlane.xlu0 %963 }
 0x64b   : > { %1751 = vrcp.f32 %v964_v7 }
 0x64c   : > { %1753 = vrcp.f32 %v962_v6 }
 0x64d   : > { %v1748_v9 = vpop.eup %1747 }
 0x64e   : > { %1555 = vmatpush3.bf16.xpose.msra.mxu0 %v1002_v51  ;;  %v1750_v47 = vpop.eup %1749  ;;  %v994_v11 = vmul.f32 %v1748_v9, %v2171_v4 }
 0x64f   : > { %1556 = vmatprep.subr.bf16.mxu0 %v1860_v1  ;;  %v993_v12 = vmul.f32 %v1750_v47, %v2168_v3  ;;  %v1684_v3 = vld [vmem:[%s2318_s6 + $0x38] sm:$0xff]  }
 0x650   : > { %1579 = vmatpush3.bf16.msra.mxu1 %v1684_v3 }
 0x651   : > { %v1003_v13 = vpack.c.bf16 %v994_v11, %v993_v12  ;;  %1584 = vmatprep.subr.bf16.mxu1 %v1860_v1 }
 0x655   : > { %v1752_v14 = vpop.eup %1751 }
 0x656   : > { %1557 = vmatpush3.bf16.xpose.msra.mxu0 %v1003_v13  ;;  %v1754_v63 = vpop.eup %1753  ;;  %v996_v60 = vmul.f32 %v1752_v14, %v2177_v5 }
 0x657   : > { %1558 = vmatprep.subr.bf16.mxu0 %v1860_v1  ;;  %v995_v16 = vmul.f32 %v1754_v63, %v2174_v56 }
 0x659   : > { %v1004_v17 = vpack.c.bf16 %v996_v60, %v995_v16 }
 0x65e   : > { %1559 = vmatpush3.bf16.xpose.msra.mxu0 %v1004_v17 }
 0x665   : > { %1561 = vmatmul.mubr.bf16.vlgmr.msra.gmra.mrb[4].mxu0 %v714_v35 }
 0x738   : > { %v1039_v4 = vpop.f32.mrb[4].mxu0 }
 0x739   : > { %v1562_v18 = vpop.f32.mrb[5].mxu0 }
 0x73a   : > { %v1042_v20 = vpop.f32.mrb[6].mxu0 }
 0x73b   : > { %v1050_v23 = vpack.c.bf16 %v1042_v20, %v1039_v4  ;;  %v1563_v5 = vpop.f32.mrb[7].mxu0 }
 0x73d   : > { %1581 = vmatmul.mubr.bf16.vlgmr.msra.gmra.mrb[24].mxu1 %v1050_v23 }
 0x73e   : > { %1588 = vmatprep.mubr.msk.bf16.mxu1 %vm1861_vm0, %v1860_v1  ;;  %1585 = vmatpush3.bf16.msra.mxu1 %v1685_v10 }
 0x73f   : > { %1586 = vmatprep.subr.bf16.mxu1 %v1860_v1 }
 0x742   : > { %1587 = vmatpush3.bf16.msra.mxu1 %v1686_v15 }
 0x810   : > { %v1149_v56 = vpop.f32.mrb[24].mxu1 }
 0x811   : > { %v1156_v31 = vadd.f32 %v1149_v56, %v2073_v21  ;;  %v1582_v34 = vpop.f32.mrb[25].mxu1 }
 0x812   : > { %v1152_v35 = vpop.f32.mrb[26].mxu1 }
 0x813   : > { %v1157_v24 = vadd.f32 %v1152_v35, %v2075_v22  ;;  %v1583_v27 = vpop.f32.mrb[27].mxu1  ;;  %v1160_v28 = vsel %vm422_vm5, %v1156_v31, 0.0  ;;  %v1465_v35 = vld [vmem:[#allocation3 + $0x6] ss:$0 sm:$0xff] }
 0x814   : > { %1161 = vadd.xlane.f32.xlu1 %v1160_v28  ;;  %v1466_v28 = vld [vmem:[#allocation3 + $0x7] ss:$0 sm:$0xff] }
 0x815   : > { %v1163_v30 = vsel %vm422_vm5, %v1157_v24, 0.0 }
 0x816   : > { %1164 = vadd.xlane.f32.xlu0 %v1163_v30 }
 0x8a1   : > { %v1162_v36 = vpop.xlane.xlu1 %1161 }
 0x8a2   : > { %v1166_v37 = vmul.f32 0.03125, %v1162_v36 }
 0x8a3   : > { %v1165_v38 = vpop.xlane.xlu0 %1164 }
 0x8a4   : > { %v1168_v40 = vsub.f32 %v1156_v31, %v1166_v37  ;;  %v1167_v41 = vmul.f32 0.03125, %v1165_v38 }
 0x8a6   : > { %v1169_v42 = vsub.f32 %v1157_v24, %v1167_v41  ;;  %v1170_v44 = vmul.f32 %v1168_v40, %v1168_v40 }
 0x8a8   : > { %v1172_v21 = vsel %vm422_vm5, %v1170_v44, 0.0  ;;  %v1171_v45 = vmul.f32 %v1169_v42, %v1169_v42 }
 0x8a9   : > { %1173 = vadd.xlane.f32.xlu1 %v1172_v21 }
 0x8aa   : > { %v1175_v22 = vsel %vm422_vm5, %v1171_v45, 0.0 }
 0x8ab   : > { %1176 = vadd.xlane.f32.xlu0 %v1175_v22 }
 0x936   : > { %v1174_v46 = vpop.xlane.xlu1 %1173 }
 0x937   : > { %v1178_v48 = vmul.f32 0.03125, %v1174_v46 }
 0x938   : > { %v1177_v49 = vpop.xlane.xlu0 %1176 }
 0x939   : > { %v1180_v50 = vadd.f32 1e-05, %v1178_v48  ;;  %v1179_v52 = vmul.f32 0.03125, %v1177_v49 }
 0x93b   : > { %1755 = vrsqrt.f32 %v1180_v50  ;;  %v1181_v19 = vadd.f32 1e-05, %v1179_v52 }
 0x93d   : > { %1757 = vrsqrt.f32 %v1181_v19 }
 0x945   : > { %v1756_v25 = vpop.eup %1755 }
 0x946   : > { %v1184_v55 = vmul.f32 %v1756_v25, %v1168_v40 }
 0x947   : > { %v1758_v54 = vpop.eup %1757 }
 0x948   : > { %v1190_v33 = vmul.f32 %v1459_v53, %v1184_v55  ;;  %v1185_v61 = vmul.f32 %v1758_v54, %v1169_v42 }
 0x94a   : > { %v1191_v62 = vmul.f32 %v1459_v53, %v1185_v61  ;;  %v1196_v57 = vadd.f32 %v1460_v32, %v1190_v33 }
 0x94c   : > { %v1197_v0 = vadd.f32 %v1460_v32, %v1191_v62 }
 0x94e   : > { %v1198_v1 = vpack.c.bf16 %v1197_v0, %v1196_v57 }
 0x950   : > { %1589 = vmatmul.mubr.msk.bf16.vlgmr.msra.gmra.mrb[28].mxu1 %vm422_vm5, %v1198_v1 }
 0xa23   : > { %v1252_v2 = vpop.f32.mrb[28].mxu1 }
 0xa24   : > { %v1259_v59 = vadd.f32 %v1252_v2, %v2083_v26  ;;  %v1590_v39 = vpop.f32.mrb[29].mxu1 }
 0xa25   : > { %v1255_v58 = vpop.f32.mrb[30].mxu1 }
 0xa26   : > { %v1266_v6 = vadd.f32 %v1464_v43, %v1259_v59  ;;  %v1260_v7 = vadd.f32 %v1255_v58, %v2085_v29  ;;  %v1591_v8 = vpop.f32.mrb[31].mxu1 }
 0xa28   : > { %v1267_v51 = vadd.f32 %v1464_v43, %v1260_v7  ;;  %v1268_v9 = vmax.f32 %v1266_v6, 0.0 }
 0xa2a   : > { %v1272_v47 = vsel %vm422_vm5, %v1268_v9, 0.0  ;;  %v1269_v11 = vmax.f32 %v1267_v51, 0.0 }
 0xa2b   : > { %1273 = vadd.xlane.f32.xlu1 %v1272_v47 }
 0xa2c   : > { %v1275_v12 = vsel %vm422_vm5, %v1269_v11, 0.0 }
 0xa2d   : > { %1276 = vadd.xlane.f32.xlu0 %v1275_v12 }
 0xab8   : > { %v1274_v13 = vpop.xlane.xlu1 %1273 }
 0xab9   : > { %v1278_v14 = vmul.f32 0.03125, %v1274_v13 }
 0xaba   : > { %v1277_v63 = vpop.xlane.xlu0 %1276 }
 0xabb   : > { %v1280_v60 = vsub.f32 %v1268_v9, %v1278_v14  ;;  %v1279_v26 = vmul.f32 0.03125, %v1277_v63 }
 0xabd   : > { %v1281_v16 = vsub.f32 %v1269_v11, %v1279_v26  ;;  %v1282_v17 = vmul.f32 %v1280_v60, %v1280_v60 }
 0xabf   : > { %v1284_v29 = vsel %vm422_vm5, %v1282_v17, 0.0  ;;  %v1283_v3 = vmul.f32 %v1281_v16, %v1281_v16 }
 0xac0   : > { %1285 = vadd.xlane.f32.xlu1 %v1284_v29 }
 0xac1   : > { %v1287_v4 = vsel %vm422_vm5, %v1283_v3, 0.0 }
 0xac2   : > { %1288 = vadd.xlane.f32.xlu0 %v1287_v4 }
 0xb4d   : > { %v1286_v18 = vpop.xlane.xlu1 %1285 }
 0xb4e   : > { %v1290_v20 = vmul.f32 0.03125, %v1286_v18 }
 0xb4f   : > { %v1289_v23 = vpop.xlane.xlu0 %1288 }
 0xb50   : > { %v1292_v5 = vadd.f32 1e-05, %v1290_v20  ;;  %v1291_v56 = vmul.f32 0.03125, %v1289_v23 }
 0xb52   : > { %1759 = vrsqrt.f32 %v1292_v5  ;;  %v1293_v31 = vadd.f32 1e-05, %v1291_v56 }
 0xb54   : > { %1761 = vrsqrt.f32 %v1293_v31 }
 0xb5c   : > { %v1760_v34 = vpop.eup %1759 }
 0xb5d   : > { %v1296_v24 = vmul.f32 %v1760_v34, %v1280_v60 }
 0xb5e   : > { %v1762_v27 = vpop.eup %1761 }
 0xb5f   : > { %v1302_v30 = vmul.f32 %v1465_v35, %v1296_v24  ;;  %v1297_v36 = vmul.f32 %v1762_v27, %v1281_v16 }
 0xb61   : > { %v1308_v37 = vadd.f32 %v1466_v28, %v1302_v30  ;;  %v1303_v38 = vmul.f32 %v1465_v35, %v1297_v36 }
 0xb63   : > { %v1309_v40 = vadd.f32 %v1466_v28, %v1303_v38  ;;  %1310 = vst.msk [vmem:[%s328_s19] sm:$0xff] %vm422_vm5, %v1308_v37 }
 0xb65   : > { %1311 = vst.msk [vmem:[%s328_s19 + $0x8] sm:$0xff] %vm422_vm5, %v1309_v40 }
 0xb66   : > { %1804 = shalt.err (!%p1801_p7)
}
 0xb67   : > { %s1805_s10 = scalar_lea.hbm %s2265_s17, 256  ;;  %s1809_s18 = scalar_lea.hbm %s2320_s8, 512 }
 0xb68   : > { %p1806_p8 = scmp.ne.s32.totalorder %s2265_s17, %s1805_s10  ;;  %p1810_p1 = scmp.lt.u32.totalorder %s2265_s17, %s2320_s8 }
 0xb69   : > { %p1811_p0 = scmp.lt.u32.totalorder %s1809_s18, %s1805_s10  ;;  %p1813_p6 = scmp.lt.u32.totalorder %s1805_s10, %s2265_s17 }
 0xb6a   : > { %p1807_p11 = pnand %p1806_p8, %p2333_p9 }
 0xb6b   : > { %p1812_p5 = por %p1811_p0, %p1810_p1 }
 0xb6c   : > { %p1808_p13 = pneg %p1807_p11 }
 0xb6d   : > { %p1814_p10 = por %p1813_p6, %p1812_p5 }
 0xb6f   : > { %p1815_p12 = pnand %p1814_p10, %p1808_p13 }
 0xb71   : > { %1818 = shalt.err (!%p1815_p12)
}
 0xb72   : > { %s1866_s21 = smov 128   ;;  %s1867_s23 = smov 8  }
 0xb73   : > { %1596 = dma.vmem_to_hbm [thread:$0]  (%p2333_p9), %s2267_s20, 256, %s2265_s17, %s2271_s9, %s1866_s21, %s1866_s21, %s1867_s23  }
 0xb74 PF: > { %p1608_p2 = scmp.ge.s32.totalorder %s1857_s30, 2  ;;  %s1341_s24 = sand.u32 1, %s1845_s27  }
 0xb75   : > { %p2334_p3 = scmp.ne.s32.totalorder %s2325_s16, 0  ;;  %s1342_s25 = scalar_lea.sflag [#allocation5], %s1341_s24 }
 0xb77   : > { %p1603_p4 = pnand %p1608_p2, %p2334_p3 }
 0xb79   : > { %1840 = dma.done.wait (!%p1603_p4), %s1342_s25, 256  }
 0xb7a   : > { %1842 = vsyncadd (!%p1603_p4), %s1342_s25, 4294967040  ;;  %p19_p7 = scmp.ge.s32.totalorder %s1938_s11, 4   ;;  %s2335_s27 = smov %s1849_s28 }
 0xb7b   : > { %s2336_s28 = smov %s1853_s29  ;;  %s2337_s29 = smov %s1949_s14 }
 0xb7c   : > { %s2338_s30 = smov %s1938_s11  ;;  %21 = sbr.rel (!%p19_p7) target bundleno = 4 (0x4), region = 95 }
 0xb83   :  { %1347 = vsyncpa [#allocation4], 1 }
 0xb84   :  { %1349 = vsyncpa [#allocation4 + $0x1], 1 }
 0xb85   :  { %1350 = vsyncpa [#allocation5], 1 }
 0xb86   :  { %1352 = vsyncpa [#allocation5 + $0x1], 1 }

</bundles_post_ra>
